<compile_context>
chip_gen: v5e
topology: v5e:2x2
jax: 0.10.0
libtpu: 0.0.40
codegen_flags: <defaults>
</compile_context>

<pallas_src>
import jax
import jax.numpy as jnp
from jax.experimental import pallas as pl
from jax.experimental.pallas import tpu as pltpu

EPS = 1e-10


def _l2norm_kernel(x_ref, w_ref, o_ref):
    # x_ref: (1, C, T)   w_ref: (1, C, 1) resident in VMEM   o_ref: (1, C, T)
    x = x_ref[...].astype(jnp.float32)
    w = w_ref[...].astype(jnp.float32)
    # Channel reduction over the sublane axis (XLU); lanes stay fully dense.
    norm = jnp.sqrt(jnp.sum(x * x, axis=1, keepdims=True)) + EPS      # (1, 1, T)
    inv = pl.reciprocal(norm, approx=False)                           # EUP, exact
    o_ref[...] = (x * (inv * w)).astype(o_ref.dtype)


def _choose_tile_hw(hw, c, itemsize, target_block_bytes=4 * 1024 * 1024):
    """Pick a lane-tile: whole H*W if it fits, else the largest multiple of 128
    keeping one input block around target_block_bytes (double-buffered in+out
    then stays well inside v7x's 64 MiB VMEM)."""
    if hw * c * itemsize <= target_block_bytes:
        return hw  # full-extent block: allowed regardless of 128-divisibility
    t = target_block_bytes // (c * itemsize)
    t = max(128, (t // 128) * 128)  # tiled lane dim must be a multiple of 128
    return min(t, hw)


def l2norm(x_nchw, weight, *, tile_hw=None):
    """x_nchw: (N, C, H, W); weight: (C,). Returns (N, C, H, W)."""
    N, C, H, W = x_nchw.shape
    HW = H * W

    # Native layout: reshape only (no data movement), no transpose, no pad.
    x3 = x_nchw.reshape(N, C, HW)
    w3 = weight.reshape(1, C, 1)

    if tile_hw is None:
        tile_hw = _choose_tile_hw(HW, C, x_nchw.dtype.itemsize)

    grid = (N, pl.cdiv(HW, tile_hw))

    out3 = pl.pallas_call(
        _l2norm_kernel,
        out_shape=jax.ShapeDtypeStruct((N, C, HW), x_nchw.dtype),
        grid_spec=pltpu.PrefetchScalarGridSpec(
            num_scalar_prefetch=0,
            grid=grid,
            in_specs=[
                pl.BlockSpec((1, C, tile_hw), lambda n, t: (n, 0, t)),
                # Whole weight vector resident in VMEM, no per-step pipelining.
                pl.BlockSpec(memory_space=pltpu.MemorySpace.VMEM),
            ],
            out_specs=pl.BlockSpec((1, C, tile_hw), lambda n, t: (n, 0, t)),
        ),
        compiler_params=pltpu.CompilerParams(
            dimension_semantics=("parallel", "parallel"),
            vmem_limit_bytes=32 * 1024 * 1024,
        ),
    )(x3, w3)

    return out3.reshape(N, C, H, W)


def l2norm_ref(x_nchw, weight):
    norm = jnp.sqrt(jnp.sum(x_nchw.astype(jnp.float32) ** 2,
                            axis=1, keepdims=True)) + EPS
    out = x_nchw.astype(jnp.float32) / norm
    return (weight[None, :, None, None].astype(jnp.float32) * out).astype(x_nchw.dtype)


if __name__ == "__main__":
    N, C, H, W = 2, 4, 16, 16
    scale = 20.0  # L2Norm(n_channels=C, scale=20) -> weight filled with 20.0

    key = jax.random.PRNGKey(0)
    x = jax.random.normal(key, (N, C, H, W), dtype=jnp.float32)
    weight = jnp.full((C,), scale, dtype=jnp.float32)  # init.constant_(w, gamma)

    out = l2norm(x, weight)
    out = jax.block_until_ready(out)

    ref = l2norm_ref(x, weight)
    assert out.shape == (N, C, H, W)
    assert jnp.allclose(out, ref, atol=1e-5, rtol=1e-5)

    print("KERNEL_OK")
</pallas_src>

<mosaic_0001>
module attributes {stable_mosaic.version = 11 : i64} {
  func.func @_l2norm_kernel(%arg0: i32, %arg1: i32, %arg2: memref<1x4x256xf32, #tpu.memory_space<vmem>>, %arg3: memref<1x4x1xf32, #tpu.memory_space<vmem>>, %arg4: memref<1x4x256xf32, #tpu.memory_space<vmem>>) attributes {dimension_semantics = [#tpu.dimension_semantics<parallel>, #tpu.dimension_semantics<parallel>], iteration_bounds = array<i64: 2, 1>, scalar_prefetch = 0 : i64, scratch_operands = 0 : i64, tpu.core_type = #tpu.core_type<tc>, window_params = [{transform_indices = @transform_0, window_bounds = array<i64: 1, 4, 256>}, {pipeline_mode = #tpu.pipeline_mode<synchronous>, transform_indices = @transform_1, window_bounds = array<i64: 1, 4, 1>}, {transform_indices = @transform_2, window_bounds = array<i64: 1, 4, 256>}]} {
    %c0 = arith.constant 0 : index
    %c0_0 = arith.constant 0 : index
    %c0_1 = arith.constant 0 : index
    %0 = vector.load %arg2[%c0, %c0_0, %c0_1] : memref<1x4x256xf32, #tpu.memory_space<vmem>>, vector<1x4x256xf32>
    %c0_2 = arith.constant 0 : index
    %c0_3 = arith.constant 0 : index
    %c0_4 = arith.constant 0 : index
    %1 = vector.load %arg3[%c0_2, %c0_3, %c0_4] : memref<1x4x1xf32, #tpu.memory_space<vmem>>, vector<1x4x1xf32>
    %2 = arith.mulf %0, %0 : vector<1x4x256xf32>
    %cst = arith.constant dense<0.000000e+00> : vector<1x256xf32>
    %3 = vector.multi_reduction <add>, %2, %cst [1] : vector<1x4x256xf32> to vector<1x256xf32>
    %4 = vector.shape_cast %3 : vector<1x256xf32> to vector<1x1x256xf32>
    %5 = math.sqrt %4 : vector<1x1x256xf32>
    %cst_5 = arith.constant 1.000000e-10 : f32
    %6 = vector.broadcast %cst_5 : f32 to vector<1x1x256xf32>
    %7 = arith.addf %5, %6 : vector<1x1x256xf32>
    %8 = tpu.reciprocal %7 : vector<1x1x256xf32> -> vector<1x1x256xf32>
    %9 = vector.broadcast %8 : vector<1x1x256xf32> to vector<1x4x256xf32>
    %10 = vector.broadcast %1 : vector<1x4x1xf32> to vector<1x4x256xf32>
    %11 = arith.mulf %9, %10 : vector<1x4x256xf32>
    %12 = arith.mulf %0, %11 : vector<1x4x256xf32>
    %c0_6 = arith.constant 0 : index
    %c0_7 = arith.constant 0 : index
    %c0_8 = arith.constant 0 : index
    %13 = vector.load %arg4[%c0_6, %c0_7, %c0_8] : memref<1x4x256xf32, #tpu.memory_space<vmem>>, vector<1x4x256xf32>
    tpu.vector_store %arg4[%c0_6, %c0_7, %c0_8], %12 {strides = array<i32>} : memref<1x4x256xf32, #tpu.memory_space<vmem>>, vector<1x4x256xf32>,
    return
  }
  func.func @transform_0(%arg0: i32, %arg1: i32) -> (i32, i32, i32) {
    %c0_i32 = arith.constant 0 : i32
    %c0_i32_0 = arith.constant 0 : i32
    return %arg0, %c0_i32, %arg1 : i32, i32, i32
  }
  func.func @transform_1(%arg0: i32, %arg1: i32) -> (i32, i32, i32) {
    %c0_i32 = arith.constant 0 : i32
    %c0_i32_0 = arith.constant 0 : i32
    %c0_i32_1 = arith.constant 0 : i32
    %c0_i32_2 = arith.constant 0 : i32
    return %c0_i32, %c0_i32_0, %c0_i32_1 : i32, i32, i32
  }
  func.func @transform_2(%arg0: i32, %arg1: i32) -> (i32, i32, i32) {
    %c0_i32 = arith.constant 0 : i32
    %c0_i32_0 = arith.constant 0 : i32
    return %arg0, %c0_i32, %arg1 : i32, i32, i32
  }
}

</mosaic_0001>

<bundles_post_ra>
// kernel: tpu_custom_call.1
= control target key start
LH: loop header
LB: loop body
LE: loop exit
PB: predicated region body
PF: predicated region fallthrough
CT: control target
= control target key end

     0   :  { %7 = vsyncpa [#allocation3], 0  ;;  %s731_s0 = inlined_call_operand.hbm [shape: f32[2,4,256], index: 0, kind: input, shape index: {}]   ;;  %s732_s1 = inlined_call_operand.vmem [shape: f32[1,4,1], index: 1, kind: input, shape index: {}]   ;;  %s733_s2 = inlined_call_operand.hbm [shape: f32[2,4,256], index: 2, kind: output, shape index: {}]  }
   0x1   :  { %9 = vsyncpa [#allocation3 + $0x1], 0 }
   0x2   :  { %10 = vsyncpa [#allocation4], 0 }
   0x3   :  { %12 = vsyncpa [#allocation4 + $0x1], 0  ;;  %s596_s9 = smov 0   ;;  %s598_s10 = smov 0  }
   0x4   :  { %s600_s11 = smov 0   ;;  %s602_s12 = smov 0  }
   0x5   :  { %s604_s13 = smov 0   ;;  %s606_s14 = smov 0  }
   0x6 LB: > { %s377_s15 = sadd.s32 4294967295, %s578_s14   ;;  %s378_s16 = sadd.s32 4294967294, %s578_s14   ;;  %s578_s14 = sphi %s606_s14, %s18_s14   ;;  %s574_s13 = sphi %s604_s13, %s742_s13   ;;  %s570_s12 = sphi %s602_s12, %s741_s12   ;;  %s566_s11 = sphi %s600_s11, %s740_s11   ;;  %s562_s10 = sphi %s598_s10, %s739_s10   ;;  %s558_s9 = sphi %s596_s9, %s738_s9  }
   0x7   : > { %s30_s17 = sadd.s32 1, %s574_s13  ;;  %s39_s18 = sadd.s32 1, %s566_s11 }
   0x8   : > { %p32_p0 = scmp.ge.s32.totalorder %s30_s17, 2  ;;  %p46_p1 = scmp.ne.s32.totalorder %s566_s11, %s562_s10 }
   0x9   : > { %p47_p2 = scmp.eq.s32.totalorder %s578_s14, 0  ;;  %p52_p3 = scmp.ne.s32.totalorder %s562_s10, %s558_s9 }
   0xa   : > { %s744_s17 = smov (%p32_p0, %s30_s17), 0  ;;  %p53_p5 = scmp.eq.s32.totalorder %s377_s15, 0 }
   0xb   : > { %p637_p4 = por %p47_p2, %p46_p1  ;;  %s34_s20 = ssub.s32 %s574_s13, %s744_s17 }
   0xc   : > { %p99_p6 = scmp.eq.s32.totalorder %s377_s15, 1  ;;  %p37_p7 = scmp.eq.s32.totalorder %s34_s20, 0 }
   0xd   : > { %p643_p8 = por %p53_p5, %p52_p3  ;;  %p105_p10 = scmp.eq.s32.totalorder %s378_s16, 1 }
   0xe   : > { %p647_p9 = por %p99_p6, %p46_p1  ;;  %p380_p12 = scmp.ge.s32.totalorder %s578_s14, 2 }
   0xf   : > { %s652_s23 = scalar_select %p37_p7, %s566_s11, %s39_s18  }
  0x10   : > { %p654_p11 = por %p105_p10, %p52_p3  ;;  %p406_p13 = scmp.lt.s32.totalorder %s578_s14, 2 }
  0x11   : > { %s128_s25 = sand.u32 1, %s566_s11   ;;  %s392_s27 = sshll.u32 %s574_s13, 3 }
  0x12   : > { %s381_s26 = sshll.u32 %s128_s25, 3  ;;  %s139_s30 = scalar_lea.hbm %s731_s0, %s392_s27 }
  0x13   : > { %s132_s3 = scalar_lea.vmem [#allocation2], %s381_s26  ;;  %s141_s5 = sshll.u32 %s139_s30, 4  ;;  %s142_s5 = int_to_ptr.hbm [resolvable:$true] %s141_s5 }
  0x14   : > { %s143_s4 = sshll.u32 %s132_s3, 4  ;;  %p399_p0 = pnand %p406_p13, %p637_p4  ;;  %s144_s4 = int_to_ptr.vmem [resolvable:$true] %s143_s4 }
  0x15   : > { %p384_p1 = scmp.ge.s32.totalorder %s578_s14, 1  ;;  %p148_p2 = scmp.lt.s32.totalorder %s578_s14, 3 }
  0x16   : > { %s129_s6 = scalar_lea.sflag [#allocation3], %s128_s25 }
  0x17   : > { %401 = dma.hbm_to_vmem [thread:$0]  (!%p399_p0), %s142_s5, 128, %s144_s4, %s129_s6  }
  0x18   : > { %p149_p3 = pnand %p384_p1, %p148_p2 }
  0x19   : > { %s670_s7 = sand.u32 (!%p149_p3), 1, %s562_s10  }
  0x1a   : > { %152 = sbr.rel (%p149_p3) target bundleno = 159 (0x9f), region = 28  ;;  %s385_s8 = sshll.u32 (!%p149_p3), %s670_s7, 3 }
  0x1b   : > { %s155_s15 = scalar_lea.sflag (!%p149_p3), [#allocation3], %s670_s7  ;;  %s158_s16 = scalar_lea.vmem (!%p149_p3), [#allocation2], %s385_s8 }
  0x1f   : > { %549 = dma.done.wait (%p643_p8), %s155_s15, 128  }
  0x20   : > { %551 = vsyncadd (%p643_p8), %s155_s15, 4294967168  ;;  %v580_v0 = vmov 0   ;;  %v183_v1 = vld [vmem:[%s732_s1] sm:$0xf]  ;;  %v683_v2 = vld [vmem:[%s158_s16] sm:$0xff]  ;;  %vm191_vm0 = vcmask 1043456  }
  0x21   : > { %457 = vset.pattern.permute.xlu0 %v580_v0  ;;  %v184_v3 = vmul.f32 %v683_v2, %v683_v2  ;;  %s393_s20 = sshll.u32 %s570_s12, 3  ;;  %s179_s27 = scalar_lea.vmem [#allocation5], %s385_s8 }
  0x22   : > { %262 = vperm.xlu0 %457, %v183_v1   ;;  %s288_s26 = scalar_lea.hbm %s733_s2, %s393_s20  ;;  %s290_s28 = sshll.u32 %s179_s27, 4  ;;  %s291_s28 = int_to_ptr.vmem [resolvable:$true] %s290_s28 }
  0x23   : > { %186 = vst [vmem:[#allocation1] ss:$2 sm:$0xff] %v184_v3  ;;  %s292_s29 = sshll.u32 %s288_s26, 4  ;;  %s275_s12 = scalar_lea.sflag [#allocation4], %s670_s7  ;;  %s293_s29 = int_to_ptr.hbm [resolvable:$true] %s292_s29 }
  0x24   : > { %s510_s30 = sshra.s32 %s293_s29, 4  ;;  %s516_s6 = scalar_lea.hbm %s733_s2, 16  ;;  %s511_s30 = int_to_ptr.hbm [resolvable:$true] %s510_s30 }
  0x25   : > { %s512_s3 = scalar_lea.hbm %s511_s30, 8  ;;  %p517_p7 = scmp.lt.s32.totalorder %s511_s30, %s733_s2 }
  0x26   : > { %p513_p4 = scmp.ne.s32.totalorder %s511_s30, %s512_s3  ;;  %p518_p8 = scmp.lt.s32.totalorder %s516_s6, %s512_s3 }
  0x28   : > { %p514_p5 = pnand %p513_p4, %p647_p9  ;;  %p519_p10 = por %p518_p8, %p517_p7 }
  0x2a   : > { %v187_v4 = vld.sshfl [vmem:[#allocation1] sm:$0xff pattern:$0x75316420]  ;;  %v188_v5 = vld.sshfl [vmem:[#allocation1 + $0x8] sm:$0xff pattern:$0x75316420]  ;;  %p515_p6 = pneg %p514_p5 }
  0x2b   : > { %v192_v6 = vsel %vm191_vm0, %v187_v4, 0.0  ;;  %v199_v7 = vsel %vm191_vm0, %v188_v5, 0.0 }
  0x2c   : > { %v193_v8 = vrot.slane %v192_v6, 4  ;;  %v200_v9 = vrot.slane %v199_v7, 4  ;;  %p520_p13 = pnand %p519_p10, %p515_p6 }
  0x2e   : > { %v194_v10 = vadd.f32 %v193_v8, %v192_v6  ;;  %v201_v11 = vadd.f32 %v200_v9, %v199_v7 }
  0x30   : > { %v195_v12 = vrot.slane %v194_v10, 2  ;;  %v202_v13 = vrot.slane %v201_v11, 2 }
  0x32   : > { %v196_v14 = vadd.f32 %v195_v12, %v194_v10  ;;  %v203_v15 = vadd.f32 %v202_v13, %v201_v11 }
  0x34   : > { %v197_v16 = vrot.slane %v196_v14, 1  ;;  %v204_v17 = vrot.slane %v203_v15, 1 }
  0x36   : > { %v198_v18 = vadd.f32 %v197_v16, %v196_v14  ;;  %v205_v19 = vadd.f32 %v204_v17, %v203_v15 }
  0x38   : > { %458 = vrsqrt.f32 %v198_v18  ;;  %vm225_vm1 = vcmp.eq.f32.partialorder %v205_v19, inf  ;;  %vm213_vm2 = vcmp.eq.f32.partialorder %v198_v18, inf  ;;  %v228_v34 = vand.u32 2147483648, %v205_v19 }
  0x39   : > { %460 = vrsqrt.f32 %v205_v19  ;;  %vm227_vm3 = vcmp.eq.f32.partialorder %v205_v19, 0.0  ;;  %v216_v36 = vand.u32 2147483648, %v198_v18  ;;  %vm215_vm4 = vcmp.eq.f32.partialorder %v198_v18, 0.0 }
  0x3e   : > { %v459_v20 = vpop.eup %458 }
  0x3f   : > { %v461_v21 = vpop.eup %460  ;;  %v207_v23 = vmul.f32 %v459_v20, %v198_v18 }
  0x40   : > { %v219_v22 = vmul.f32 %v461_v21, %v205_v19 }
  0x41   : > { %v208_v25 = vmul.f32 %v459_v20, %v207_v23 }
  0x42   : > { %v220_v24 = vmul.f32 %v461_v21, %v219_v22 }
  0x43   : > { %v209_v27 = vmul.f32 0.5, %v208_v25 }
  0x44   : > { %v221_v26 = vmul.f32 0.5, %v220_v24 }
  0x45   : > { %v210_v29 = vsub.f32 1.5, %v209_v27 }
  0x46   : > { %v222_v28 = vsub.f32 1.5, %v221_v26 }
  0x47   : > { %v211_v31 = vmul.f32 %v459_v20, %v210_v29 }
  0x48   : > { %v223_v30 = vmul.f32 %v461_v21, %v222_v28 }
  0x49   : > { %v212_v33 = vmul.f32 %v211_v31, %v198_v18 }
  0x4a   : > { %v224_v32 = vmul.f32 %v223_v30, %v205_v19 }
  0x4b   : > { %v214_v37 = vsel %vm213_vm2, %v198_v18, %v212_v33 }
  0x4c   : > { %v226_v35 = vsel %vm225_vm1, %v205_v19, %v224_v32  ;;  %v217_v39 = vsel %vm215_vm4, %v216_v36, %v214_v37 }
  0x4d   : > { %v229_v38 = vsel %vm227_vm3, %v228_v34, %v226_v35  ;;  %v230_v41 = vadd.f32 1e-10, %v217_v39 }
  0x4e   : > { %v231_v40 = vadd.f32 1e-10, %v229_v38 }
  0x4f   : > { %vm237_vm7 = vweird.f32 %v230_v41  ;;  %v243_v53 = vand.u32 2147483648, %v230_v41  ;;  %v241_v55 = vand.u32 2147483647, %v230_v41 }
  0x50   : > { %462 = vrcp.f32 %v231_v40  ;;  %vm251_vm5 = vweird.f32 %v231_v40  ;;  %v257_v50 = vand.u32 2147483648, %v231_v40  ;;  %v255_v52 = vand.u32 2147483647, %v231_v40 }
  0x51   : > { %464 = vrcp.f32 %v230_v41  ;;  %v244_v58 = vor.u32 1.1754944e-38, %v243_v53  ;;  %vm242_vm12 = vcmp.eq.f32.partialorder %v241_v55, 8.507059e+37 }
  0x52   : > { %v258_v56 = vor.u32 1.1754944e-38, %v257_v50  ;;  %vm256_vm11 = vcmp.eq.f32.partialorder %v255_v52, 8.507059e+37 }
  0x56   : > { %v463_v42 = vpop.eup %462 }
  0x57   : > { %v465_v43 = vpop.eup %464  ;;  %v247_v44 = vmul.f32 %v463_v42, %v231_v40  ;;  %vm252_vm6 = vweird.f32 %v463_v42 }
  0x58   : > { %v233_v45 = vmul.f32 %v465_v43, %v230_v41  ;;  %vm238_vm8 = vweird.f32 %v465_v43  ;;  %vm253_vm9 = vmor %vm251_vm5, %vm252_vm6 }
  0x59   : > { %v248_v46 = vsub.f32 1.0, %v247_v44  ;;  %vm239_vm10 = vmor %vm237_vm7, %vm238_vm8 }
  0x5a   : > { %v234_v47 = vsub.f32 1.0, %v233_v45 }
  0x5b   : > { %v249_v48 = vmul.f32 %v463_v42, %v248_v46 }
  0x5c   : > { %v235_v49 = vmul.f32 %v465_v43, %v234_v47 }
  0x5d   : > { %v250_v51 = vadd.f32 %v463_v42, %v249_v48 }
  0x5e   : > { %v236_v54 = vadd.f32 %v465_v43, %v235_v49 }
  0x5f   : > { %v254_v57 = vsel %vm253_vm9, %v463_v42, %v250_v51 }
  0x60   : > { %v240_v59 = vsel %vm239_vm10, %v465_v43, %v236_v54  ;;  %v259_v60 = vsel %vm256_vm11, %v258_v56, %v254_v57 }
  0x61   : > { %v245_v62 = vsel %vm242_vm12, %v244_v58, %v240_v59 }
  0x94   : > { %v263_v61 = vpop.permute.xlu0 %262 }
  0x95   : > { %v266_v63 = vmul.f32 %v263_v61, %v259_v60  ;;  %v265_v0 = vmul.f32 %v263_v61, %v245_v62 }
  0x97   : > { %v269_v1 = vrot.slane %v266_v63, 4 }
  0x99   : > { %v270_v3 = vsel %vm191_vm0, %v265_v0, %v269_v1 }
  0x9a   : > { %v272_v4 = vmul.f32 %v270_v3, %v683_v2 }
  0x9c   : > { %273 = vst [vmem:[%s179_s27] sm:$0xff] %v272_v4 }
  0x9d   : > { %523 = shalt.err (!%p520_p13)
}
  0x9e   : > { %396 = dma.vmem_to_hbm [thread:$0]  (%p647_p9), %s291_s28, 128, %s293_s29, %s275_s12  }
  0x9f PF: > { %s304_s7 = sand.u32 1, %s558_s9   ;;  %p403_p0 = pnand %p380_p12, %p654_p11 }
  0xa0   : > { %s305_s16 = scalar_lea.sflag [#allocation4], %s304_s7 }
  0xa1   : > { %p404_p1 = pneg %p403_p0 }
  0xa3   : > { %553 = dma.done.wait (%p404_p1), %s305_s16, 128  }
  0xa4   : > { %555 = vsyncadd (%p404_p1), %s305_s16, 4294967168  ;;  %s18_s14 = sadd.s32 1, %s578_s14   ;;  %s738_s9 = smov %s562_s10 }
  0xa5   : > { %p15_p2 = scmp.ge.s32.totalorder %s18_s14, 4   ;;  %s739_s10 = smov %s566_s11 }
  0xa6   : > { %s740_s11 = smov %s652_s23  ;;  %s741_s12 = smov %s574_s13 }
  0xa7   : > { %s742_s13 = smov %s744_s17  ;;  %17 = sbr.rel (!%p15_p2) target bundleno = 6 (0x6), region = 73 }
  0xac   :  { %311 = vsyncpa [#allocation3], 1 }
  0xad   :  { %313 = vsyncpa [#allocation3 + $0x1], 1 }
  0xae   :  { %314 = vsyncpa [#allocation4], 1 }
  0xaf   :  { %316 = vsyncpa [#allocation4 + $0x1], 1 }

</bundles_post_ra>
